<compile_context>
chip_gen: v6e
topology: v6e:2x2x1
jax: 0.10.0
libtpu: 0.0.40
codegen_flags: <defaults>
</compile_context>

<pallas_src>
import numpy as np
import jax
import jax.numpy as jnp
from jax.experimental import pallas as pl
from jax.experimental.pallas import tpu as pltpu

_LANE = 128

# Packed bias / BN(eval) scale-shift table row layout:
#   0: b1     1: bn1_scale  2: bn1_shift
#   3: b2     4: bn2_scale  5: bn2_shift
#   6: b3  (fused mean||log_std bias)
#   7: bd1    8: bnd_scale  9: bnd_shift
#  10: bd2   11: bp (GraphConv bias)


def _round_up(v, m):
  return ((v + m - 1) // m) * m


def _pack_rows(arrs, width):
  rows = []
  for a in arrs:
    a = jnp.asarray(a, jnp.float32).reshape(1, -1)
    rows.append(jnp.pad(a, ((0, 0), (0, width - a.shape[1]))))
  return jnp.concatenate(rows, axis=0)


# --------------------------------------------------------------------------- #
# Kernel 1: encoder1  (SAGEConv -> ReLU -> Dropout(eval) -> BN(eval))
#           + pooling projection p = x1 @ [wprel | wproot]
# --------------------------------------------------------------------------- #
def _enc1_kernel(a_ref, x_ref, w1_ref, wp_ref, vecs_ref, out_ref):
  f32, bf16 = jnp.float32, jnp.bfloat16
  tile = out_ref.shape[0]
  H = w1_ref.shape[1]
  r0 = pl.multiple_of(pl.program_id(0) * tile, 8)
  x_blk = x_ref[pl.ds(r0, tile), :]                               # (tile, C) bf16
  # single A pass + fused [wl1; wr1] matmul
  neigh = jnp.dot(a_ref[...], x_ref[...], preferred_element_type=f32)
  h1 = (jnp.dot(jnp.concatenate([neigh.astype(bf16), x_blk], axis=-1),
                w1_ref[...], preferred_element_type=f32)
        + vecs_ref[0:1, :H])
  x1 = jnp.maximum(h1, 0.0) * vecs_ref[1:2, :H] + vecs_ref[2:3, :H]
  p = jnp.dot(x1.astype(bf16), wp_ref[...], preferred_element_type=f32)  # (tile, 2)
  slab = jnp.concatenate([x1, p], axis=-1)
  padw = out_ref.shape[1] - slab.shape[1]
  if padw:
    slab = jnp.concatenate([slab, jnp.zeros((tile, padw), f32)], axis=-1)
  out_ref[...] = slab.astype(out_ref.dtype)


# --------------------------------------------------------------------------- #
# Kernel 2: encoder2 front (SAGEConv -> ReLU -> Dropout(eval) -> BN(eval))
#           + local layer-3 products x2@wl3 / x2@wr3+b3 + SAG pooling score
# --------------------------------------------------------------------------- #
def _enc2_kernel(a_ref, s1_ref, deg_ref, w2_ref, w3c_ref, vecs_ref,
                 out_ref, score_ref):
  f32, bf16 = jnp.float32, jnp.bfloat16
  tile = out_ref.shape[0]
  H = w2_ref.shape[0] // 2                     # hidden
  H2 = w2_ref.shape[1]                         # 2H
  O4 = w3c_ref.shape[1]                        # 4O
  O2 = O4 // 2                                 # 2O
  r0 = pl.multiple_of(pl.program_id(0) * tile, 8)
  s1_blk = s1_ref[pl.ds(r0, tile), :]
  x1_blk = s1_blk[:, :H]                                           # bf16

  # ONE A-tile MXU pass aggregates x1 (cols :H) and p_rel (col H) together.
  agg = jnp.dot(a_ref[...], s1_ref[...], preferred_element_type=f32)
  neigh1 = agg[:, :H]
  agg_prel = agg[:, H:H + 1]

  h2 = (jnp.dot(jnp.concatenate([neigh1.astype(bf16), x1_blk], axis=-1),
                w2_ref[...], preferred_element_type=f32)
        + vecs_ref[3:4, :H2])
  x2 = jnp.maximum(h2, 0.0) * vecs_ref[4:5, :H2] + vecs_ref[5:6, :H2]

  # encoder2 tail reassociated: A@(x2@wl3) is done in kernel 3; here we emit
  # x2@wl3 and the root term x2@wr3 + b3 via one fused [wl3 | wr3] matmul.
  ml_loc = jnp.dot(x2.astype(bf16), w3c_ref[...], preferred_element_type=f32)
  x2wl3 = ml_loc[:, :O2]
  x2wr3b = ml_loc[:, O2:O4] + vecs_ref[6:7, :O2]
  slab = jnp.concatenate([x2wl3, x2wr3b], axis=-1)
  padw = out_ref.shape[1] - slab.shape[1]
  if padw:
    slab = jnp.concatenate([slab, jnp.zeros((tile, padw), f32)], axis=-1)
  out_ref[...] = slab.astype(out_ref.dtype)

  # SAGPooling GraphConv(add) score, kept f32 end-to-end:
  #   (A_sum@x1)@wprel + x1@wproot + bp == deg*(A_mean@(x1@wprel)) + p_root + bp
  p_root_blk = s1_blk[:, H + 1:H + 2].astype(f32)
  score_ref[...] = jnp.tanh(deg_ref[...] * agg_prel + p_root_blk
                            + vecs_ref[11:12, 0:1])


# --------------------------------------------------------------------------- #
# Kernel 3: mean||log_std aggregation + reparameterize + decoder
# --------------------------------------------------------------------------- #
def _dec_kernel(a_ref, s2_ref, s1_ref, eps_ref, wd1_ref, wd2_ref, vecs_ref,
                out_ref):
  f32, bf16 = jnp.float32, jnp.bfloat16
  tile = out_ref.shape[0]
  O, H = wd1_ref.shape
  C = wd2_ref.shape[1]
  O2 = 2 * O
  r0 = pl.multiple_of(pl.program_id(0) * tile, 8)
  s2_blk = s2_ref[pl.ds(r0, tile), :]

  # ONE A-tile MXU pass: aggregate the pre-projected x2@wl3 columns.
  agg = jnp.dot(a_ref[...], s2_ref[...], preferred_element_type=f32)
  ml = agg[:, :O2] + s2_blk[:, O2:2 * O2].astype(f32)   # + (x2@wr3 + b3)
  mean = ml[:, :O]
  log_std = ml[:, O:O2]

  # reparameterize with pre-reduced noise (z is linear in eps)
  z = mean + jnp.exp(log_std) * eps_ref[...]

  # decoder: Linear -> ReLU -> Dropout(eval) -> BN(eval) -> +x1 -> Linear
  hd = jnp.maximum(
      jnp.dot(z.astype(bf16), wd1_ref[...], preferred_element_type=f32)
      + vecs_ref[7:8, :H], 0.0)
  x1_blk = s1_ref[:, :H].astype(f32)
  hd = hd * vecs_ref[8:9, :H] + vecs_ref[9:10, :H] + x1_blk
  recon = (jnp.dot(hd.astype(bf16), wd2_ref[...], preferred_element_type=f32)
           + vecs_ref[10:11, :C])
  padw = out_ref.shape[1] - C
  if padw:
    recon = jnp.concatenate([recon, jnp.zeros((tile, padw), f32)], axis=-1)
  out_ref[...] = recon


# --------------------------------------------------------------------------- #
# Parameters (PyTorch-style init; weights pre-transposed to [in, out])
# --------------------------------------------------------------------------- #
def init_params(key, in_channels, hidden_channels, out_channels):
  C, H, O = in_channels, hidden_channels, out_channels
  bn_eps = 1e-5

  def linear(k, fan_in, shape):
    bound = 1.0 / float(np.sqrt(fan_in))
    return jax.random.uniform(k, shape, jnp.float32, -bound, bound)

  ks = jax.random.split(key, 16)
  bn_scale = lambda n: jnp.full((1, n), 1.0 / np.sqrt(1.0 + bn_eps), jnp.float32)
  bn_shift = lambda n: jnp.zeros((1, n), jnp.float32)

  return dict(
      wl1=linear(ks[0], C, (C, H)), wr1=linear(ks[1], C, (C, H)),
      b1=linear(ks[2], C, (1, H)), bn1s=bn_scale(H), bn1b=bn_shift(H),
      wl2=linear(ks[3], H, (H, 2 * H)), wr2=linear(ks[4], H, (H, 2 * H)),
      b2=linear(ks[5], H, (1, 2 * H)), bn2s=bn_scale(2 * H), bn2b=bn_shift(2 * H),
      # encoder2[3]: SAGEConv(2H -> 2O), mean||log_std kept fused
      wl3=linear(ks[6], 2 * H, (2 * H, 2 * O)),
      wr3=linear(ks[7], 2 * H, (2 * H, 2 * O)),
      b3=linear(ks[8], 2 * H, (1, 2 * O)),
      wd1=linear(ks[9], O, (O, H)), bd1=linear(ks[10], O, (1, H)),
      bnds=bn_scale(H), bndb=bn_shift(H),
      wd2=linear(ks[11], H, (H, C)), bd2=linear(ks[12], H, (1, C)),
      wprel=linear(ks[13], H, (H, 1)),
      wproot=linear(ks[14], H, (H, 1)),
      bp=linear(ks[15], H, (1, 1)),
  )


# --------------------------------------------------------------------------- #
# Generation-aware tile / VMEM selection
# --------------------------------------------------------------------------- #
def _choose_tile(n, tile_n):
  try:
    phys = int(pltpu.get_tpu_info().vmem_capacity_bytes)
  except Exception:
    phys = 64 * 1024 * 1024                       # v7x per-TensorCore floor
  vmem_target = min(int(0.65 * phys), 100 * 1024 * 1024)

  tile = max(8, min(_round_up(tile_n, 8), _round_up(n, 8)))
  n_pad = _round_up(n, tile)
  # >= 2 row tiles so the "parallel" grid axis can shard across both v7x TCs.
  if n_pad // tile < 2 and n > 8:
    tile = _round_up((n + 1) // 2, 8)

  def vmem_need(t, npad):
    a_stream = 2 * t * npad * 2                   # double-buffered bf16 A rows
    residents = 2 * (2 * npad * _LANE * 2 + npad * 64 * 4)  # bf16 slabs + misc
    out_stream = 2 * t * _LANE * 4
    return a_stream + residents + out_stream + (4 << 20)

  while tile > 8 and vmem_need(tile, _round_up(n, tile)) > vmem_target:
    tile = max(8, _round_up(tile // 2, 8))
  n_pad = _round_up(n, tile)
  return tile, n_pad, max(vmem_target, 32 * 1024 * 1024)


# --------------------------------------------------------------------------- #
# Forward wrapper
# --------------------------------------------------------------------------- #
def vae_forward(params, x, edge_index, batch, noise, *, tile_n=256):
  """Equivalent of VAE.forward -> (reconstruction, x_unpooled, edge_index_unpooled)."""
  N, C = x.shape
  H = params["wl1"].shape[1]
  O = params["wd1"].shape[0]
  f32, bf16 = jnp.float32, jnp.bfloat16

  tile, N_pad, vmem_limit = _choose_tile(N, tile_n)
  grid = (N_pad // tile,)

  # Dense adjacency (glue), built without f32 N^2 temporaries: scatter 1/deg
  # per edge directly into a zero-padded bf16 (N_pad, N_pad) matrix.
  src, dst = edge_index[0], edge_index[1]
  deg = jnp.zeros((N_pad,), f32).at[dst].add(1.0)
  inv_deg = jnp.where(deg > 0, 1.0 / jnp.maximum(deg, 1.0), 0.0)
  A_mean = (jnp.zeros((N_pad, N_pad), bf16)
            .at[dst, src].add(inv_deg[dst].astype(bf16)))
  deg_col = deg[:, None]                                     # (N_pad, 1) f32

  # z = mean + std * mean_s(eps_s): pre-reduce the noise in the wrapper.
  eps_mean = jnp.mean(noise, axis=0).astype(f32)             # (N, O)
  eps_p = jnp.zeros((N_pad, O), f32).at[:N, :].set(eps_mean)
  x_p = jnp.zeros((N_pad, C), bf16).at[:N, :].set(x.astype(bf16))

  # Stacked / fused bf16 MXU weights (f32 accumulation in-kernel).
  w1s = jnp.concatenate([params["wl1"], params["wr1"]], axis=0).astype(bf16)
  w2s = jnp.concatenate([params["wl2"], params["wr2"]], axis=0).astype(bf16)
  w3c = jnp.concatenate([params["wl3"], params["wr3"]], axis=1).astype(bf16)
  wp = jnp.concatenate([params["wprel"], params["wproot"]], axis=1).astype(bf16)
  wd1 = params["wd1"].astype(bf16)
  wd2 = params["wd2"].astype(bf16)

  VW = _round_up(max(2 * H, 2 * O, H, C, 1), _LANE)
  vecs = _pack_rows(
      [params[k] for k in ("b1", "bn1s", "bn1b", "b2", "bn2s", "bn2b", "b3",
                           "bd1", "bnds", "bndb", "bd2", "bp")], VW)

  P1 = _round_up(H + 2, _LANE)      # slab1: x1 || (x1@wprel, x1@wproot)
  P2 = _round_up(4 * O, _LANE)      # slab2: x2@wl3 || x2@wr3+b3
  P3 = _round_up(C, _LANE)          # slab3: recon

  def rows(a):
    nd = a.ndim
    return pl.BlockSpec((tile,) + tuple(a.shape[1:]),
                        lambda i: (i,) + (0,) * (nd - 1))

  def full(a):
    nd = a.ndim
    return pl.BlockSpec(a.shape, lambda i: (0,) * nd)

  cp = pltpu.CompilerParams(dimension_semantics=("parallel",),
                            vmem_limit_bytes=int(vmem_limit))
  a_bytes = N_pad * N_pad * 2

  s1 = pl.pallas_call(
      _enc1_kernel, grid=grid,
      in_specs=[rows(A_mean), full(x_p), full(w1s), full(wp), full(vecs)],
      out_specs=pl.BlockSpec((tile, P1), lambda i: (i, 0)),
      out_shape=jax.ShapeDtypeStruct((N_pad, P1), bf16),
      compiler_params=cp,
      cost_estimate=pl.CostEstimate(
          flops=2 * N_pad * (N_pad * C + 2 * C * H + 2 * H),
          transcendentals=0,
          bytes_accessed=a_bytes + 2 * N_pad * C + 2 * N_pad * P1),
  )(A_mean, x_p, w1s, wp, vecs)

  s2, score_col = pl.pallas_call(
      _enc2_kernel, grid=grid,
      in_specs=[rows(A_mean), full(s1), rows(deg_col), full(w2s), full(w3c),
                full(vecs)],
      out_specs=(pl.BlockSpec((tile, P2), lambda i: (i, 0)),
                 pl.BlockSpec((tile, 1), lambda i: (i, 0))),
      out_shape=(jax.ShapeDtypeStruct((N_pad, P2), bf16),
                 jax.ShapeDtypeStruct((N_pad, 1), f32)),
      compiler_params=cp,
      cost_estimate=pl.CostEstimate(
          flops=2 * N_pad * (N_pad * P1 + 4 * H * H + 8 * H * O),
          transcendentals=N_pad,
          bytes_accessed=a_bytes + 2 * N_pad * (P1 + P2) + 8 * N_pad),
  )(A_mean, s1, deg_col, w2s, w3c, vecs)

  s3 = pl.pallas_call(
      _dec_kernel, grid=grid,
      in_specs=[rows(A_mean), full(s2), rows(s1), rows(eps_p),
                full(wd1), full(wd2), full(vecs)],
      out_specs=pl.BlockSpec((tile, P3), lambda i: (i, 0)),
      out_shape=jax.ShapeDtypeStruct((N_pad, P3), f32),
      compiler_params=cp,
      cost_estimate=pl.CostEstimate(
          flops=2 * N_pad * (N_pad * P2 + O * H + H * C),
          transcendentals=N_pad * O,
          bytes_accessed=a_bytes + 2 * N_pad * (P1 + P2) + 4 * N_pad * (O + P3)),
  )(A_mean, s2, s1, eps_p, wd1, wd2, vecs)

  x1 = s1[:N, :H].astype(f32)
  recon = s3[:N, :C]
  score = score_col[:N, 0]

  # ---- SAGPooling top-k (ratio=0.5) + filter_adj + PoolUnpoolGraph mapping ----
  # Per-graph sizes are static (from `batch`), so top-k selection and the
  # x1[perm] gather run on device; no early host sync.
  batch_np = np.asarray(jax.device_get(batch))
  perm_parts = []
  for g in np.unique(batch_np):
    size = int((batch_np == g).sum())
    k = int(np.ceil(0.5 * size))
    key_vec = jnp.where(batch == int(g), -score, jnp.inf)
    perm_parts.append(jnp.argsort(key_vec)[:k])      # stable desc-by-score
  perm = jnp.concatenate(perm_parts)
  x_unpooled = x1[perm]

  keep = jnp.isin(edge_index[0], perm) & jnp.isin(edge_index[1], perm)
  # TODO(synk): edge compaction has a data-dependent output shape -> one host
  # round-trip at the very end (after all device work is enqueued).
  keep_np = np.asarray(jax.device_get(keep))
  edge_index_unpooled = np.asarray(edge_index)[:, keep_np]
  return recon, x_unpooled, edge_index_unpooled


if __name__ == "__main__":
  in_channels, hidden_channels, out_channels, n_samples = 8, 16, 8, 10
  N = 32  # two graphs of 16 nodes each -> row grid of 2 tiles with tile_n=16

  key = jax.random.PRNGKey(0)
  kp, kx, kn = jax.random.split(key, 3)
  params = init_params(kp, in_channels, hidden_channels, out_channels)
  x = jax.random.normal(kx, (N, in_channels), jnp.float32)

  # Two directed rings (both directions) -> 64 edges total; batch assignment 0/1.
  def ring(lo, hi):
    idx = np.arange(lo, hi)
    nxt = np.concatenate([idx[1:], idx[:1]])
    return np.stack([np.concatenate([idx, nxt]), np.concatenate([nxt, idx])], axis=0)

  ei = np.concatenate([ring(0, 16), ring(16, 32)], axis=1)
  edge_index = jnp.asarray(ei, jnp.int32)
  batch = jnp.asarray(np.repeat(np.arange(2), 16), jnp.int32)
  noise = jax.random.normal(kn, (n_samples, N, out_channels), jnp.float32)

  recon, x_unpooled, edge_index_unpooled = vae_forward(
      params, x, edge_index, batch, noise, tile_n=16)
  jax.block_until_ready(recon)
  jax.block_until_ready(x_unpooled)

  assert recon.shape == (N, in_channels)
  assert x_unpooled.shape == (16, hidden_channels)   # ceil(0.5*16) per graph * 2
  assert edge_index_unpooled.shape[0] == 2
  assert np.all(np.isfinite(np.asarray(recon)))
  assert np.all(np.isfinite(np.asarray(x_unpooled)))
  print("KERNEL_OK")
</pallas_src>

<mosaic_0001>
module attributes {stable_mosaic.version = 11 : i64} {
  func.func @_enc1_kernel(%arg0: i32, %arg1: memref<16x32xbf16, #tpu.memory_space<vmem>>, %arg2: memref<32x8xbf16, #tpu.memory_space<vmem>>, %arg3: memref<16x16xbf16, #tpu.memory_space<vmem>>, %arg4: memref<16x2xbf16, #tpu.memory_space<vmem>>, %arg5: memref<12x128xf32, #tpu.memory_space<vmem>>, %arg6: memref<16x128xbf16, #tpu.memory_space<vmem>>) attributes {dimension_semantics = [#tpu.dimension_semantics<parallel>], iteration_bounds = array<i64: 2>, scalar_prefetch = 0 : i64, scratch_operands = 0 : i64, tpu.core_type = #tpu.core_type<tc>, window_params = [{transform_indices = @transform_0, window_bounds = array<i64: 16, 32>}, {pipeline_mode = #tpu.pipeline_mode<synchronous>, transform_indices = @transform_1, window_bounds = array<i64: 32, 8>}, {pipeline_mode = #tpu.pipeline_mode<synchronous>, transform_indices = @transform_2, window_bounds = array<i64: 16, 16>}, {pipeline_mode = #tpu.pipeline_mode<synchronous>, transform_indices = @transform_3, window_bounds = array<i64: 16, 2>}, {pipeline_mode = #tpu.pipeline_mode<synchronous>, transform_indices = @transform_4, window_bounds = array<i64: 12, 128>}, {transform_indices = @transform_5, window_bounds = array<i64: 16, 128>}]} {
    %c16_i32 = arith.constant 16 : i32
    %0 = arith.muli %arg0, %c16_i32 : i32
    %1 = tpu.assume_multiple %0, 8 : i32
    %2 = arith.index_cast %1 : i32 to index
    %c0 = arith.constant 0 : index
    %3 = vector.load %arg2[%2, %c0] : memref<32x8xbf16, #tpu.memory_space<vmem>>, vector<16x8xbf16>
    %c0_0 = arith.constant 0 : index
    %c0_1 = arith.constant 0 : index
    %4 = vector.load %arg1[%c0_0, %c0_1] : memref<16x32xbf16, #tpu.memory_space<vmem>>, vector<16x32xbf16>
    %c0_2 = arith.constant 0 : index
    %c0_3 = arith.constant 0 : index
    %5 = vector.load %arg2[%c0_2, %c0_3] : memref<32x8xbf16, #tpu.memory_space<vmem>>, vector<32x8xbf16>
    %cst = arith.constant dense<0.000000e+00> : vector<16x8xf32>
    %6 = tpu.matmul %4, %5, %cst {dimension_numbers = #tpu.dot_dimension_numbers<[1], [0], [0], [1], [0, 0, 1, 1], [], []>} : vector<16x32xbf16>, vector<32x8xbf16>, vector<16x8xf32> -> vector<16x8xf32>
    %7 = arith.truncf %6 : vector<16x8xf32> to vector<16x8xbf16>
    %8 = tpu.concatenate %7, %3 in 1 : vector<16x8xbf16>, vector<16x8xbf16> -> vector<16x16xbf16>
    %c0_4 = arith.constant 0 : index
    %c0_5 = arith.constant 0 : index
    %9 = vector.load %arg3[%c0_4, %c0_5] : memref<16x16xbf16, #tpu.memory_space<vmem>>, vector<16x16xbf16>
    %cst_6 = arith.constant dense<0.000000e+00> : vector<16x16xf32>
    %10 = tpu.matmul %8, %9, %cst_6 {dimension_numbers = #tpu.dot_dimension_numbers<[1], [0], [0], [1], [0, 0, 1, 1], [], []>} : vector<16x16xbf16>, vector<16x16xbf16>, vector<16x16xf32> -> vector<16x16xf32>
    %c0_7 = arith.constant 0 : index
    %c0_8 = arith.constant 0 : index
    %11 = vector.load %arg5[%c0_7, %c0_8] : memref<12x128xf32, #tpu.memory_space<vmem>>, vector<1x16xf32>
    %12 = vector.broadcast %11 : vector<1x16xf32> to vector<16x16xf32>
    %13 = arith.addf %10, %12 : vector<16x16xf32>
    %cst_9 = arith.constant 0.000000e+00 : f32
    %14 = vector.broadcast %cst_9 : f32 to vector<16x16xf32>
    %15 = arith.maximumf %13, %14 : vector<16x16xf32>
    %c1 = arith.constant 1 : index
    %c0_10 = arith.constant 0 : index
    %16 = vector.load %arg5[%c1, %c0_10] : memref<12x128xf32, #tpu.memory_space<vmem>>, vector<1x16xf32>
    %17 = vector.broadcast %16 : vector<1x16xf32> to vector<16x16xf32>
    %18 = arith.mulf %15, %17 : vector<16x16xf32>
    %c2 = arith.constant 2 : index
    %c0_11 = arith.constant 0 : index
    %19 = vector.load %arg5[%c2, %c0_11] : memref<12x128xf32, #tpu.memory_space<vmem>>, vector<1x16xf32>
    %20 = vector.broadcast %19 : vector<1x16xf32> to vector<16x16xf32>
    %21 = arith.addf %18, %20 : vector<16x16xf32>
    %22 = arith.truncf %21 : vector<16x16xf32> to vector<16x16xbf16>
    %c0_12 = arith.constant 0 : index
    %c0_13 = arith.constant 0 : index
    %23 = vector.load %arg4[%c0_12, %c0_13] : memref<16x2xbf16, #tpu.memory_space<vmem>>, vector<16x2xbf16>
    %cst_14 = arith.constant dense<0.000000e+00> : vector<16x2xf32>
    %24 = tpu.matmul %22, %23, %cst_14 {dimension_numbers = #tpu.dot_dimension_numbers<[1], [0], [0], [1], [0, 0, 1, 1], [], []>} : vector<16x16xbf16>, vector<16x2xbf16>, vector<16x2xf32> -> vector<16x2xf32>
    %25 = tpu.concatenate %21, %24 in 1 : vector<16x16xf32>, vector<16x2xf32> -> vector<16x18xf32>
    %cst_15 = arith.constant 0.000000e+00 : f32
    %26 = vector.broadcast %cst_15 : f32 to vector<16x110xf32>
    %27 = tpu.concatenate %25, %26 in 1 : vector<16x18xf32>, vector<16x110xf32> -> vector<16x128xf32>
    %28 = arith.truncf %27 : vector<16x128xf32> to vector<16x128xbf16>
    %c0_16 = arith.constant 0 : index
    %c0_17 = arith.constant 0 : index
    %29 = vector.load %arg6[%c0_16, %c0_17] : memref<16x128xbf16, #tpu.memory_space<vmem>>, vector<16x128xbf16>
    tpu.vector_store %arg6[%c0_16, %c0_17], %28 {strides = array<i32>} : memref<16x128xbf16, #tpu.memory_space<vmem>>, vector<16x128xbf16>,
    return
  }
  func.func @transform_0(%arg0: i32) -> (i32, i32) {
    %c0_i32 = arith.constant 0 : i32
    %c0_i32_0 = arith.constant 0 : i32
    return %arg0, %c0_i32 : i32, i32
  }
  func.func @transform_1(%arg0: i32) -> (i32, i32) {
    %c0_i32 = arith.constant 0 : i32
    %c0_i32_0 = arith.constant 0 : i32
    %c0_i32_1 = arith.constant 0 : i32
    return %c0_i32, %c0_i32_0 : i32, i32
  }
  func.func @transform_2(%arg0: i32) -> (i32, i32) {
    %c0_i32 = arith.constant 0 : i32
    %c0_i32_0 = arith.constant 0 : i32
    %c0_i32_1 = arith.constant 0 : i32
    return %c0_i32, %c0_i32_0 : i32, i32
  }
  func.func @transform_3(%arg0: i32) -> (i32, i32) {
    %c0_i32 = arith.constant 0 : i32
    %c0_i32_0 = arith.constant 0 : i32
    %c0_i32_1 = arith.constant 0 : i32
    return %c0_i32, %c0_i32_0 : i32, i32
  }
  func.func @transform_4(%arg0: i32) -> (i32, i32) {
    %c0_i32 = arith.constant 0 : i32
    %c0_i32_0 = arith.constant 0 : i32
    %c0_i32_1 = arith.constant 0 : i32
    return %c0_i32, %c0_i32_0 : i32, i32
  }
  func.func @transform_5(%arg0: i32) -> (i32, i32) {
    %c0_i32 = arith.constant 0 : i32
    %c0_i32_0 = arith.constant 0 : i32
    return %arg0, %c0_i32 : i32, i32
  }
}

</mosaic_0001>

<bundles_post_ra>
// kernel: tpu_custom_call.1
= control target key start
LH: loop header
LB: loop body
LE: loop exit
PB: predicated region body
PF: predicated region fallthrough
CT: control target
= control target key end

     0   :  { %10 = vsyncpa [#allocation3], 0  ;;  %s982_s0 = inlined_call_operand.vmem [shape: bf16[32,32], index: 0, kind: input, shape index: {}]   ;;  %s983_s1 = inlined_call_operand.vmem [shape: bf16[32,8], index: 1, kind: input, shape index: {}]   ;;  %s984_s2 = inlined_call_operand.hbm [shape: bf16[16,16], index: 2, kind: input, shape index: {}]   ;;  %s985_s3 = inlined_call_operand.vmem [shape: bf16[16,2], index: 3, kind: input, shape index: {}]   ;;  %s986_s4 = inlined_call_operand.vmem [shape: f32[12,128], index: 4, kind: input, shape index: {}]   ;;  %s987_s5 = inlined_call_operand.hbm [shape: bf16[32,128], index: 5, kind: output, shape index: {}]  }
   0x1   :  { %11 = vsyncpa [#allocation4], 0 }
   0x2   :  { %13 = vsyncpa [#allocation4 + $0x1], 0  ;;  %s834_s18 = smov 0   ;;  %s836_s19 = smov 0  }
   0x3   :  { %s838_s20 = smov 0   ;;  %s840_s21 = smov 0  }
   0x4 LB: > { %s855_s22 = sadd.s32 4294967295, %s792_s21   ;;  %s568_s23 = sadd.s32 4294967294, %s792_s21   ;;  %s792_s21 = sphi %s840_s21, %s995_s21   ;;  %s788_s20 = sphi %s838_s20, %s994_s20   ;;  %s784_s19 = sphi %s836_s19, %s993_s19   ;;  %s780_s18 = sphi %s834_s18, %s992_s18  }
   0x5   : > { %s859_s24 = sadd.s32 1, %s792_s21   ;;  %s136_s25 = sadd.s32 1, %s788_s20 }
   0x6   : > { %s133_s26 = ssub.s32 %s792_s21, %s859_s24  ;;  %p146_p0 = scmp.ne.s32.totalorder %s788_s20, %s784_s19 }
   0x7   : > { %p134_p1 = scmp.eq.s32.totalorder %s133_s26, 0  ;;  %p147_p2 = scmp.eq.s32.totalorder %s855_s22, 1 }
   0x8   : > { %p152_p3 = scmp.ne.s32.totalorder %s784_s19, %s780_s18  ;;  %p153_p4 = scmp.eq.s32.totalorder %s568_s23, 1 }
   0x9   : > { %s870_s27 = scalar_select %p134_p1, %s788_s20, %s136_s25  }
   0xa   : > { %p872_p5 = por %p147_p2, %p146_p0  ;;  %p876_p6 = por %p153_p4, %p152_p3 }
   0xb   : > { %p569_p7 = scmp.ge.s32.totalorder %s792_s21, 1  ;;  %p160_p8 = scmp.lt.s32.totalorder %s792_s21, 3 }
   0xc   : > { %s989_s29 = scalar_select %p876_p6, 1, 0 }
   0xd   : > { %p647_p9 = scmp.eq.s32.totalorder %s855_s22, 0  ;;  %p883_p10 = pnand %p569_p7, %p160_p8 }
   0xe   : > { %s794_s6 = smov [#allocation2]  }
   0xf   : > { %s175_s7 = sshll.u32 %s794_s6, 4  ;;  %p639_p11 = pneg %p883_p10  ;;  %s176_s7 = int_to_ptr.vmem [resolvable:$true] %s175_s7 }
  0x10   : > { %s713_s8 = scalar_lea.vmem %s176_s7, 128  ;;  %p721_p3 = scmp.lt.s32.totalorder %s176_s7, %s176_s7 }
  0x11   : > { %p640_p12 = pnand %p647_p9, %p639_p11  ;;  %p714_p0 = scmp.ne.s32.totalorder %s176_s7, %s713_s8 }
  0x12   : > { %p722_p4 = scmp.lt.s32.totalorder %s713_s8, %s713_s8 }
  0x13   : > { %p704_p13 = pneg %p640_p12 }
  0x14   : > { %p723_p6 = por %p722_p4, %p721_p3 }
  0x15   : > { %p716_p1 = pnand %p714_p0, %p704_p13 }
  0x17   : > { %p717_p2 = pneg %p716_p1 }
  0x19   : > { %p724_p7 = pnand %p723_p6, %p717_p2 }
  0x1b   : > { %727 = shalt.err (!%p724_p7)
}
  0x1c   : > { %s795_s9 = smov 64   ;;  %s796_s10 = smov 4  }
  0x1d   : > { %642 = dma.hbm_to_vmem [thread:$0]  (!%p640_p12), %s984_s2, 128, %s176_s7, [#allocation3], %s795_s9, %s795_s9, %s796_s10  }
  0x1e   : > { %206 = sbr.rel (%p883_p10) target bundleno = 787 (0x313), region = 40 }
  0x23   : > { %771 = dma.done.wait (%p647_p9), [#allocation3], 128  }
  0x24   : > { %773 = vsyncadd (%p647_p9), [#allocation3], 4294967168  ;;  %s575_s13 = sshll.u32 %s855_s22, 1  ;;  %v797_v0 = vmov 0.0   ;;  %vm798_vm0 = vmmov 0   ;;  %s577_s14 = sshll.u32 %s855_s22, 4 }
  0x25   : > { %613 = vmatprep.subr.bf16.mxu0 %v797_v0  ;;  %617 = vmatprep.mubr.msk.bf16.mxu0 %vm798_vm0, %v797_v0  ;;  %p235_p6 = scmp.lt.s32.totalorder %s575_s13, 3  ;;  %s243_s15 = sshra.s32 %s577_s14, 3  ;;  %v696_v1 = vld [vmem:[%s983_s1 + $0x8] sm:$0xff]   ;;  %v697_v2 = vld [vmem:[%s983_s1] sm:$0xff]   ;;  %vm272_vm1 = vcmask 261120   ;;  %vm325_vm2 = vcmask 64512  }
  0x26   : > { %621 = vmatprep.subr.bf16.mxu1 %v797_v0  ;;  %623 = vmatprep.mubr.msk.bf16.mxu1 %vm798_vm0, %v797_v0  ;;  %s578_s16 = sshll.u32 %s243_s15, 2  ;;  %s799_s12 = smov 8   ;;  %v700_v5 = vld [vmem:[#allocation2] sm:$0xff]   ;;  %vm342_vm3 = vcmask 130048   ;;  %vm465_vm4 = vcmask 146432  }
  0x27   : > { %s997_s13 = smov (!%p235_p6, %s575_s13), 3  ;;  %s246_s6 = scalar_lea.vmem %s983_s1, %s578_s16  ;;  %614 = vmatpush3.bf16.msra.mxu0 %v696_v1  ;;  %622 = vmatpush3.bf16.msra.mxu1 %v700_v5  ;;  %v701_v13 = vld [vmem:[%s985_s3] sm:$0xff]  }
  0x28   : > { %s576_s17 = sshll.u32 %s997_s13, 2  ;;  %615 = vmatprep.subr.bf16.mxu0 %v797_v0  ;;  %v699_v3 = vld [vmem:[%s246_s6] sm:$0xff]   ;;  %627 = vmatprep.subr.bf16.mxu1 %v797_v0  ;;  %s800_s30 = smov 16  }
  0x29   : > { %s238_s9 = scalar_lea.vmem %s982_s0, %s576_s17  ;;  %323 = vrot.lane.b32.xlu0 %v699_v3, %s799_s12  ;;  %v584_v14 = vld [vmem:[%s986_s4] ss:$0 sm:$0xff]  ;;  %v587_v19 = vld [vmem:[%s986_s4 + $0x1] ss:$0 sm:$0xff]  ;;  %v588_v25 = vld [vmem:[%s986_s4 + $0x2] ss:$0 sm:$0xff] }
  0x2a   : > { %v698_v4 = vld [vmem:[%s238_s9] sm:$0xff]   ;;  %s231_s6 = sand.u32 1, %s784_s19   ;;  %s600_s8 = sshll.u32 %s855_s22, 7 }
  0x2b   : > { %616 = vmatpush3.bf16.msra.mxu0 %v697_v2  ;;  %s574_s7 = sshll.u32 %s231_s6, 3  ;;  %s938_s13 = scalar_lea.hbm %s987_s5, %s600_s8 }
  0x2c   : > { %s233_s9 = scalar_lea.vmem [#allocation5], %s574_s7  ;;  %s942_s22 = scalar_lea.sflag [#allocation4], %s231_s6 }
  0x2d   : > { %s492_s10 = sshll.u32 %s233_s9, 4  ;;  %s801_s15 = smov [#allocation5]   ;;  %s940_s10 = int_to_ptr.vmem [resolvable:$true] %s492_s10 }
  0x2e   : > { %618 = vmatmul.mubr.msk.bf16.vlgmr.msra.gmra.mxu0 %vm272_vm1, %v698_v4  ;;  %s728_s14 = scalar_lea.vmem %s940_s10, 128  ;;  %s732_s16 = sshll.u32 %s801_s15, 4  ;;  %s733_s16 = int_to_ptr.vmem [resolvable:$false] %s732_s16 }
  0x2f   : > { %p729_p8 = scmp.ne.s32.totalorder %s940_s10, %s728_s14  ;;  %s734_s17 = scalar_lea.vmem %s733_s16, 256 }
  0x30   : > { %p735_p11 = scmp.lt.s32.totalorder %s940_s10, %s733_s16  ;;  %p736_p12 = scmp.lt.s32.totalorder %s734_s17, %s728_s14 }
  0x31   : > { %p730_p9 = pnand %p729_p8, %p872_p5 }
  0x32   : > { %p737_p13 = por %p736_p12, %p735_p11 }
  0x33   : > { %p731_p10 = pneg %p730_p9 }
  0x35   : > { %p738_p0 = pnand %p737_p13, %p731_p10 }
  0x9b   : > { %v324_v9 = vpop.permute.xlu0 %323 }
  0xee   : > { %v310_v6 = vpop.f32.mrf.mxu0 }
  0xf0   : > { %v619_v7 = vpop.f32.mrf.mxu0 }
  0xf2   : > { %v313_v8 = vpop.f32.mrf.mxu0 }
  0xf3   : > { %v317_v10 = vpack.c.bf16 %v313_v8, %v310_v6 }
  0xf4   : > { %v620_v11 = vpop.f32.mrf.mxu0 }
  0xf5   : > { %v328_v12 = vsel %vm325_vm2, %v317_v10, %v324_v9 }
  0xf6   : > { %624 = vmatmul.mubr.msk.bf16.vlgmr.msra.gmra.mxu1 %vm342_vm3, %v328_v12 }
  0xf7   : > { %629 = vmatprep.mubr.msk.bf16.mxu1 %vm798_vm0, %v797_v0  ;;  %628 = vmatpush3.bf16.msra.mxu1 %v701_v13 }
 0x1b6   : > { %v379_v15 = vpop.f32.mrf.mxu1 }
 0x1b7   : > { %v380_v16 = vadd.f32 %v584_v14, %v379_v15 }
 0x1b8   : > { %v625_v17 = vpop.f32.mrf.mxu1 }
 0x1b9   : > { %v386_v18 = vmax.f32 %v380_v16, 0.0 }
 0x1ba   : > { %v382_v20 = vpop.f32.mrf.mxu1 }
 0x1bb   : > { %v383_v21 = vadd.f32 %v584_v14, %v382_v20  ;;  %v393_v23 = vmul.f32 %v587_v19, %v386_v18 }
 0x1bc   : > { %v626_v22 = vpop.f32.mrf.mxu1 }
 0x1bd   : > { %v387_v24 = vmax.f32 %v383_v21, 0.0  ;;  %v400_v27 = vadd.f32 %v588_v25, %v393_v23 }
 0x1bf   : > { %v394_v26 = vmul.f32 %v587_v19, %v387_v24 }
 0x1c1   : > { %v401_v28 = vadd.f32 %v588_v25, %v394_v26 }
 0x1c3   : > { %v402_v29 = vpack.c.bf16 %v401_v28, %v400_v27 }
 0x1c5   : > { %630 = vmatmul.mubr.msk.bf16.vlgmr.msra.gmra.mxu1 %vm342_vm3, %v402_v29 }
 0x285   : > { %v448_v30 = vpop.f32.mrf.mxu1 }
 0x287   : > { %v631_v31 = vpop.f32.mrf.mxu1 }
 0x289   : > { %v451_v32 = vpop.f32.mrf.mxu1 }
 0x28a   : > { %v691_v33 = vpack.i.bf16 %v451_v32, %v448_v30 }
 0x28b   : > { %v632_v34 = vpop.f32.mrf.mxu1 }
 0x28c   : > { %692 = vrot.lane.b32.xlu0 %v691_v33, %s800_s30 }
 0x2fe   : > { %v693_v35 = vpop.permute.xlu0 %692 }
 0x2ff   : > { %v695_v36 = vunpack.i.h.bf16 %v693_v35  ;;  %v694_v37 = vunpack.i.l.bf16 %v693_v35 }
 0x301   : > { %v464_v38 = vsel %vm342_vm3, %v401_v28, %v695_v36  ;;  %v463_v39 = vsel %vm342_vm3, %v400_v27, %v694_v37 }
 0x302   : > { %v467_v40 = vsel %vm465_vm4, %v464_v38, 0.0  ;;  %v466_v41 = vsel %vm465_vm4, %v463_v39, 0.0 }
 0x303   : > { %v604_v42 = vpack.c.bf16 %v467_v40, %v466_v41 }
 0x305   : > { %605 = vst [vmem:[%s233_s9] sm:$0xff] %v604_v42  }
 0x306   : > { %741 = shalt.err (!%p738_p0)
}
 0x307   : > { %s742_s23 = scalar_lea.hbm %s938_s13, 128  ;;  %s746_s30 = scalar_lea.hbm %s987_s5, 256 }
 0x308   : > { %p743_p1 = scmp.ne.s32.totalorder %s938_s13, %s742_s23  ;;  %p747_p4 = scmp.lt.s32.totalorder %s938_s13, %s987_s5 }
 0x309   : > { %p748_p7 = scmp.lt.s32.totalorder %s746_s30, %s742_s23 }
 0x30a   : > { %p744_p2 = pnand %p743_p1, %p872_p5 }
 0x30b   : > { %p749_p6 = por %p748_p7, %p747_p4 }
 0x30c   : > { %p745_p3 = pneg %p744_p2 }
 0x30e   : > { %p750_p8 = pnand %p749_p6, %p745_p3 }
 0x310   : > { %753 = shalt.err (!%p750_p8)
}
 0x311   : > { %s802_s8 = smov 64   ;;  %s803_s9 = smov 4  }
 0x312   : > { %637 = dma.vmem_to_hbm [thread:$0]  (%p872_p5), %s940_s10, 128, %s938_s13, %s942_s22, %s802_s8, %s802_s8, %s803_s9  }
 0x313 PF: > { %p649_p9 = scmp.ge.s32.totalorder %s792_s21, 2  ;;  %s507_s11 = sand.u32 1, %s780_s18  }
 0x314   : > { %p991_p10 = scmp.ne.s32.totalorder %s989_s29, 0  ;;  %s508_s12 = scalar_lea.sflag [#allocation4], %s507_s11 }
 0x316   : > { %p644_p11 = pnand %p649_p9, %p991_p10 }
 0x318   : > { %p645_p12 = pneg %p644_p11 }
 0x31a   : > { %775 = dma.done.wait (%p645_p12), %s508_s12, 128  }
 0x31b   : > { %777 = vsyncadd (%p645_p12), %s508_s12, 4294967168  ;;  %p16_p13 = scmp.ge.s32.totalorder %s859_s24, 4   ;;  %s992_s18 = smov %s784_s19 }
 0x31c   : > { %s993_s19 = smov %s788_s20  ;;  %s994_s20 = smov %s870_s27 }
 0x31d   : > { %s995_s21 = smov %s859_s24  ;;  %18 = sbr.rel (!%p16_p13) target bundleno = 4 (0x4), region = 81 }
 0x322   :  { %513 = vsyncpa [#allocation3], 1 }
 0x323   :  { %515 = vsyncpa [#allocation3 + $0x1], 1 }
 0x324   :  { %516 = vsyncpa [#allocation4], 1 }
 0x325   :  { %518 = vsyncpa [#allocation4 + $0x1], 1 }

</bundles_post_ra>
